<compile_context>
chip_gen: v6e
topology: v6e:2x2x1
jax: 0.10.0
libtpu: 0.0.40
codegen_flags: <defaults>
</compile_context>

<pallas_src>
import functools

import numpy as np
import jax
import jax.numpy as jnp
from jax.experimental import pallas as pl
from jax.experimental.pallas import tpu as pltpu


# ----------------------------- parameter setup -----------------------------

def _round_up(x, m):
    return ((x + m - 1) // m) * m


def _cdiv(a, b):
    return -(-a // b)


def _hamming_periodic(win_len):
    # scipy.signal.get_window('hamming', win_len, fftbins=True)
    n = np.arange(win_len)
    return 0.54 - 0.46 * np.cos(2.0 * np.pi * n / win_len)


def init_kernels_np(win_len, fft_len, win_type="hamming"):
    """Deterministic re-implementation of init_kernels (forward STFT basis)."""
    if win_type is None or win_type == "None":
        window = np.ones(win_len)
    elif win_type == "hamming":
        window = _hamming_periodic(win_len) ** 0.5
    else:
        raise ValueError(f"unsupported win_type {win_type}")
    N = fft_len
    fourier_basis = np.fft.rfft(np.eye(N))[:win_len]            # (win_len, N//2+1)
    real_kernel = np.real(fourier_basis)
    imag_kernel = np.imag(fourier_basis)
    kernel = np.concatenate([real_kernel, imag_kernel], 1).T    # (N+2, win_len)
    kernel = kernel * window                                    # window each tap
    return kernel.astype(np.float32)                            # conv1d weight (out_ch, win_len)


# ------------------------------- Pallas kernel ------------------------------

def _stft_kernel(w_ref, frames_ref, mags_ref, phase_ref, *, dim_pad, chunk):
    # w_ref      : (2*dim_pad, win_len)  bf16 fused real|imag DFT basis (resident)
    # frames_ref : (1, win_len, TL)      bf16 channel-major frames for this tile
    # outputs    : (1, dim_pad, TL)      f32  channel-major, lane-dense in TL
    w = w_ref[...]
    n_chunks = frames_ref.shape[-1] // chunk
    # Static Python loop over lane sub-chunks: matmul of chunk c+1 (MXU) gets
    # interleaved with the sqrt/arctan2 epilogue of chunk c (VALU/EUP) by the
    # LLO scheduler, instead of serializing the two phases.
    for c in range(n_chunks):
        cs = c * chunk
        fr = frames_ref[0, :, pl.ds(cs, chunk)]                  # (win_len, chunk) bf16
        out = jnp.dot(w, fr, preferred_element_type=jnp.float32)  # (2*dim_pad, chunk) f32
        real = out[:dim_pad, :]                                   # aligned sublane slice
        imag = out[dim_pad:, :]
        mags_ref[0, :, pl.ds(cs, chunk)] = jnp.sqrt(real * real + imag * imag)
        phase_ref[0, :, pl.ds(cs, chunk)] = jnp.arctan2(imag, real)


# --------------------------------- wrapper ----------------------------------

def conv_stft(x, win_len, win_inc, fft_len=None, win_type="hamming",
              feature_type="real", frame_tile=1024, epilogue_chunk=256):
    """Matches ConvSTFT.forward for feature_type='real' (the default)."""
    if fft_len is None:
        fft_len = int(2 ** np.ceil(np.log2(win_len)))
    assert feature_type == "real"

    kernel = init_kernels_np(win_len, fft_len, win_type)         # (fft_len+2, win_len)
    dim = fft_len // 2 + 1
    dim_pad = _round_up(dim, 8)                                  # sublane-aligned halves

    # Fused, padded weight: rows [0:dim] real basis, rows [dim_pad:dim_pad+dim]
    # imag basis, remaining rows zero (-> mags=0, phase=atan2(0,0)=0, sliced off).
    # bf16 inputs to the MXU; accumulation stays f32 inside the kernel.
    w_cat = np.zeros((2 * dim_pad, win_len), np.float32)
    w_cat[:dim] = kernel[:dim]
    w_cat[dim_pad:dim_pad + dim] = kernel[dim:]
    w_cat = jnp.asarray(w_cat).astype(jnp.bfloat16)

    if x.ndim == 3:                                              # (B, 1, T) -> (B, T)
        x = x[:, 0, :]
    B, T = x.shape
    L = (T - win_len) // win_inc + 1                             # number of STFT frames

    # Frame-tile size: multiple of 128 lanes, capped by frame_tile.
    TL = _round_up(min(frame_tile, _round_up(L, 128)), 128)
    # v7x megacore occupancy: keep >=2 grid steps when B==1 so the frame axis
    # shards across both TensorCores (single-TC v5e/v6e unaffected).
    if B == 1 and L > 128:
        TL = min(TL, _round_up(_cdiv(L, 2), 128))
    L_pad = _round_up(L, TL)
    n_tiles = L_pad // TL
    chunk = epilogue_chunk if (epilogue_chunk <= TL and TL % epilogue_chunk == 0) else 128

    # Channel-major framing WITHOUT an XLA gather: view the signal hop-major and
    # stitch R = ceil(win_len/win_inc) contiguous slices (each transposed to
    # channel-major).  The im2col buffer is bf16.
    # (See TODO at top of file about the remaining HBM duplication this implies.)
    R = _cdiv(win_len, win_inc)
    n_hops = L_pad + R - 1
    T_need = n_hops * win_inc
    if T_need <= T:
        x_use = x[:, :T_need]
    else:
        x_use = jnp.pad(x, ((0, 0), (0, T_need - T)))
    x_hop = x_use.astype(jnp.bfloat16).reshape(B, n_hops, win_inc)
    frames = jnp.concatenate(
        [x_hop[:, r:r + L_pad, :].transpose(0, 2, 1) for r in range(R)], axis=1)
    frames = frames[:, :win_len, :]                              # (B, win_len, L_pad) bf16

    # VMEM budget (double-buffered input + 2 double-buffered outputs + weights
    # + per-chunk f32 matmul intermediate), capped at 75% of this chip's VMEM.
    frames_blk = win_len * TL * 2
    out_blk = dim_pad * TL * 4
    w_bytes = 2 * dim_pad * win_len * 2
    acc_bytes = 2 * (2 * dim_pad) * chunk * 4
    vmem_need = 2 * frames_blk + 4 * out_blk + 2 * w_bytes + acc_bytes
    try:
        vmem_cap = pltpu.get_tpu_info().vmem_capacity_bytes
    except Exception:
        vmem_cap = 64 << 20                                      # v7x-safe fallback
    vmem_limit = int(min(max(2 * vmem_need + (4 << 20), 16 << 20),
                         (3 * vmem_cap) // 4))

    cost = pl.CostEstimate(
        flops=2 * B * L_pad * win_len * (2 * dim_pad),
        transcendentals=4 * B * L_pad * dim_pad,                 # sqrt + (heavy) arctan2
        bytes_accessed=(2 * B * win_len * L_pad                  # bf16 frames
                        + 2 * 2 * dim_pad * win_len              # bf16 weights
                        + 4 * 2 * B * dim_pad * L_pad),          # f32 mags + phase
    )

    mags, phase = pl.pallas_call(
        functools.partial(_stft_kernel, dim_pad=dim_pad, chunk=chunk),
        out_shape=(jax.ShapeDtypeStruct((B, dim_pad, L_pad), jnp.float32),
                   jax.ShapeDtypeStruct((B, dim_pad, L_pad), jnp.float32)),
        grid=(B, n_tiles),
        in_specs=[
            pl.BlockSpec((2 * dim_pad, win_len), lambda b, t: (0, 0)),   # resident weights
            pl.BlockSpec((1, win_len, TL), lambda b, t: (b, 0, t)),      # frame tile
        ],
        out_specs=(
            pl.BlockSpec((1, dim_pad, TL), lambda b, t: (b, 0, t)),
            pl.BlockSpec((1, dim_pad, TL), lambda b, t: (b, 0, t)),
        ),
        compiler_params=pltpu.CompilerParams(
            dimension_semantics=("parallel", "parallel"),
            vmem_limit_bytes=vmem_limit,
        ),
        cost_estimate=cost,
    )(w_cat, frames)

    # Drop dim / frame padding; already in PyTorch's (B, dim, L) layout.
    return mags[:, :dim, :L], phase[:, :dim, :L]


# ----------------------------------- main ------------------------------------

if __name__ == "__main__":
    key = jax.random.PRNGKey(0)
    B, T = 2, 128
    win_len, win_inc, fft_len = 16, 8, 16

    x = jax.random.normal(key, (B, T), dtype=jnp.float32)

    mags, phase = conv_stft(x, win_len, win_inc, fft_len, win_type="hamming",
                            feature_type="real")
    jax.block_until_ready((mags, phase))

    # numpy reference (same math as the F.conv1d path in the PyTorch module),
    # with signal and DFT basis quantized to bf16 exactly as the kernel
    # consumes them (MXU products are exact; accumulation is f32).
    kernel = init_kernels_np(win_len, fft_len, "hamming")        # (fft_len+2, win_len)
    kernel_bf = np.asarray(jnp.asarray(kernel).astype(jnp.bfloat16).astype(jnp.float32))
    x_bf = np.asarray(jnp.asarray(x).astype(jnp.bfloat16).astype(jnp.float32))
    L = (T - win_len) // win_inc + 1
    dim = fft_len // 2 + 1
    idx = np.arange(L)[:, None] * win_inc + np.arange(win_len)[None, :]
    frames_np = x_bf[:, idx]                                     # (B, L, win_len)
    out_np = np.einsum("blk,fk->bfl", frames_np, kernel_bf)      # (B, fft_len+2, L)
    real_np, imag_np = out_np[:, :dim], out_np[:, dim:]
    mags_np = np.sqrt(real_np ** 2 + imag_np ** 2)

    assert mags.shape == (B, dim, L) and phase.shape == (B, dim, L)
    np.testing.assert_allclose(np.asarray(mags), mags_np, rtol=2e-3, atol=2e-3)
    # Phase checked via reconstruction (robust near zero-magnitude bins).
    np.testing.assert_allclose(np.asarray(mags) * np.cos(np.asarray(phase)),
                               real_np, rtol=2e-3, atol=2e-3)
    np.testing.assert_allclose(np.asarray(mags) * np.sin(np.asarray(phase)),
                               imag_np, rtol=2e-3, atol=2e-3)

    print("KERNEL_OK")
</pallas_src>

<mosaic_0001>
module attributes {stable_mosaic.version = 11 : i64} {
  func.func @_stft_kernel(%arg0: i32, %arg1: i32, %arg2: memref<32x16xbf16, #tpu.memory_space<vmem>>, %arg3: memref<1x16x128xbf16, #tpu.memory_space<vmem>>, %arg4: memref<1x16x128xf32, #tpu.memory_space<vmem>>, %arg5: memref<1x16x128xf32, #tpu.memory_space<vmem>>) attributes {dimension_semantics = [#tpu.dimension_semantics<parallel>, #tpu.dimension_semantics<parallel>], iteration_bounds = array<i64: 2, 1>, scalar_prefetch = 0 : i64, scratch_operands = 0 : i64, tpu.core_type = #tpu.core_type<tc>, window_params = [{pipeline_mode = #tpu.pipeline_mode<synchronous>, transform_indices = @transform_0, window_bounds = array<i64: 32, 16>}, {transform_indices = @transform_1, window_bounds = array<i64: 1, 16, 128>}, {transform_indices = @transform_2, window_bounds = array<i64: 1, 16, 128>}, {transform_indices = @transform_3, window_bounds = array<i64: 1, 16, 128>}]} {
    %c0 = arith.constant 0 : index
    %c0_0 = arith.constant 0 : index
    %0 = vector.load %arg2[%c0, %c0_0] : memref<32x16xbf16, #tpu.memory_space<vmem>>, vector<32x16xbf16>
    %c0_1 = arith.constant 0 : index
    %c0_2 = arith.constant 0 : index
    %c0_3 = arith.constant 0 : index
    %1 = vector.load %arg3[%c0_1, %c0_2, %c0_3] : memref<1x16x128xbf16, #tpu.memory_space<vmem>>, vector<1x16x128xbf16>
    %2 = vector.shape_cast %1 : vector<1x16x128xbf16> to vector<16x128xbf16>
    %cst = arith.constant dense<0.000000e+00> : vector<32x128xf32>
    %3 = tpu.matmul %0, %2, %cst {dimension_numbers = #tpu.dot_dimension_numbers<[1], [0], [0], [1], [0, 0, 1, 1], [], []>} : vector<32x16xbf16>, vector<16x128xbf16>, vector<32x128xf32> -> vector<32x128xf32>
    %4 = vector.extract_strided_slice %3 {offsets = [0, 0], sizes = [16, 128], strides = [1, 1]} : vector<32x128xf32> to vector<16x128xf32>
    %5 = vector.extract_strided_slice %3 {offsets = [16, 0], sizes = [16, 128], strides = [1, 1]} : vector<32x128xf32> to vector<16x128xf32>
    %6 = arith.mulf %4, %4 : vector<16x128xf32>
    %7 = arith.mulf %5, %5 : vector<16x128xf32>
    %8 = arith.addf %6, %7 : vector<16x128xf32>
    %9 = math.sqrt %8 : vector<16x128xf32>
    %c0_4 = arith.constant 0 : index
    %c0_5 = arith.constant 0 : index
    %c0_6 = arith.constant 0 : index
    %10 = vector.load %arg4[%c0_4, %c0_5, %c0_6] : memref<1x16x128xf32, #tpu.memory_space<vmem>>, vector<1x16x128xf32>
    %11 = vector.shape_cast %10 : vector<1x16x128xf32> to vector<16x128xf32>
    %12 = vector.shape_cast %9 : vector<16x128xf32> to vector<1x16x128xf32>
    tpu.vector_store %arg4[%c0_4, %c0_5, %c0_6], %12 {strides = array<i32>} : memref<1x16x128xf32, #tpu.memory_space<vmem>>, vector<1x16x128xf32>,
    %13 = math.atan2 %5, %4 : vector<16x128xf32>
    %c0_7 = arith.constant 0 : index
    %c0_8 = arith.constant 0 : index
    %c0_9 = arith.constant 0 : index
    %14 = vector.load %arg5[%c0_7, %c0_8, %c0_9] : memref<1x16x128xf32, #tpu.memory_space<vmem>>, vector<1x16x128xf32>
    %15 = vector.shape_cast %14 : vector<1x16x128xf32> to vector<16x128xf32>
    %16 = vector.shape_cast %13 : vector<16x128xf32> to vector<1x16x128xf32>
    tpu.vector_store %arg5[%c0_7, %c0_8, %c0_9], %16 {strides = array<i32>} : memref<1x16x128xf32, #tpu.memory_space<vmem>>, vector<1x16x128xf32>,
    return
  }
  func.func @transform_0(%arg0: i32, %arg1: i32) -> (i32, i32) {
    %c0_i32 = arith.constant 0 : i32
    %c0_i32_0 = arith.constant 0 : i32
    %c0_i32_1 = arith.constant 0 : i32
    return %c0_i32, %c0_i32_0 : i32, i32
  }
  func.func @transform_1(%arg0: i32, %arg1: i32) -> (i32, i32, i32) {
    %c0_i32 = arith.constant 0 : i32
    %c0_i32_0 = arith.constant 0 : i32
    return %arg0, %c0_i32, %arg1 : i32, i32, i32
  }
  func.func @transform_2(%arg0: i32, %arg1: i32) -> (i32, i32, i32) {
    %c0_i32 = arith.constant 0 : i32
    %c0_i32_0 = arith.constant 0 : i32
    return %arg0, %c0_i32, %arg1 : i32, i32, i32
  }
  func.func @transform_3(%arg0: i32, %arg1: i32) -> (i32, i32, i32) {
    %c0_i32 = arith.constant 0 : i32
    %c0_i32_0 = arith.constant 0 : i32
    return %arg0, %c0_i32, %arg1 : i32, i32, i32
  }
}

</mosaic_0001>

<bundles_post_ra>
// kernel: tpu_custom_call.1
= control target key start
LH: loop header
LB: loop body
LE: loop exit
PB: predicated region body
PF: predicated region fallthrough
CT: control target
= control target key end

     0   :  { %9 = vsyncpa [#allocation3], 0  ;;  %s1045_s0 = inlined_call_operand.vmem [shape: bf16[32,16], index: 0, kind: input, shape index: {}]   ;;  %s1046_s1 = inlined_call_operand.vmem [shape: bf16[2,16,128], index: 1, kind: input, shape index: {}]   ;;  %s1047_s2 = inlined_call_operand.hbm [shape: f32[2,16,128], index: 2, kind: output, shape index: {0}]   ;;  %s1048_s3 = inlined_call_operand.hbm [shape: f32[2,16,128], index: 3, kind: output, shape index: {1}]  }
   0x1   :  { %11 = vsyncpa [#allocation3 + $0x1], 0 }
   0x2   :  { %12 = vsyncpa [#allocation5], 0 }
   0x3   :  { %14 = vsyncpa [#allocation5 + $0x1], 0  ;;  %s796_s12 = smov 0   ;;  %s798_s13 = smov 0  }
   0x4   :  { %s800_s14 = smov 0   ;;  %s802_s15 = smov 0  }
   0x5   :  { %s804_s16 = smov 0   ;;  %s806_s17 = smov 0  }
   0x6 LB: > { %s553_s18 = sadd.s32 4294967295, %s768_s17   ;;  %s554_s19 = sadd.s32 4294967294, %s768_s17   ;;  %s768_s17 = sphi %s806_s17, %s20_s17   ;;  %s764_s16 = sphi %s804_s16, %s1055_s16   ;;  %s760_s15 = sphi %s802_s15, %s1054_s15   ;;  %s756_s14 = sphi %s800_s14, %s1053_s14   ;;  %s752_s13 = sphi %s798_s13, %s1052_s13   ;;  %s748_s12 = sphi %s796_s12, %s1051_s12  }
   0x7   : > { %s32_s20 = sadd.s32 1, %s764_s16  ;;  %s90_s21 = sadd.s32 1, %s756_s14 }
   0x8   : > { %p34_p0 = scmp.ge.s32.totalorder %s32_s20, 2  ;;  %p100_p1 = scmp.ne.s32.totalorder %s756_s14, %s752_s13 }
   0x9   : > { %p101_p2 = scmp.eq.s32.totalorder %s553_s18, 1  ;;  %p106_p3 = scmp.ne.s32.totalorder %s752_s13, %s748_s12 }
   0xa   : > { %s1057_s20 = smov (%p34_p0, %s32_s20), 0  ;;  %p107_p5 = scmp.eq.s32.totalorder %s554_s19, 1 }
   0xb   : > { %p836_p4 = por %p101_p2, %p100_p1  ;;  %s85_s23 = ssub.s32 %s764_s16, %s1057_s20 }
   0xc   : > { %p557_p6 = scmp.ge.s32.totalorder %s768_s17, 1  ;;  %p88_p7 = scmp.eq.s32.totalorder %s85_s23, 0 }
   0xd   : > { %p843_p8 = por %p107_p5, %p106_p3  ;;  %p167_p9 = scmp.lt.s32.totalorder %s768_s17, 3 }
   0xe   : > { %s849_s25 = scalar_select %p88_p7, %s756_s14, %s90_s21  }
   0xf   : > { %p168_p10 = pnand %p557_p6, %p167_p9 }
  0x10   : > { %p199_p11 = scmp.lt.s32.totalorder (!%p168_p10), %s760_s15, 1  ;;  %s895_s8 = sand.u32 (!%p168_p10), 1, %s752_s13  }
  0x11   : > { %171 = sbr.rel (%p168_p10) target bundleno = 323 (0x143), region = 28  ;;  %s558_s9 = sshll.u32 (!%p168_p10), %s895_s8, 4 }
  0x12   : > { %s576_s10 = sshll.u32 (!%p168_p10), %s760_s15, 8  ;;  %s191_s11 = scalar_lea.vmem (!%p168_p10), [#allocation2], %s558_s9 }
  0x13   : > { %s424_s18 = sshll.u32 (!%p168_p10), %s191_s11, 4  ;;  %s919_s23 = scalar_lea.hbm (!%p168_p10), %s1047_s2, %s576_s10  ;;  %s921_s18 = int_to_ptr.vmem [resolvable:$true] %s424_s18 }
  0x14   : > { %s405_s26 = scalar_lea.sflag (!%p168_p10), [#allocation3], %s895_s8  ;;  %s662_s27 = scalar_lea.vmem (!%p168_p10), %s921_s18, 256 }
  0x15   : > { %p663_p12 = scmp.ne.s32.totalorder (!%p168_p10), %s921_s18, %s662_s27 }
  0x16   : > { %v652_v0 = vld [vmem:[%s1045_s0] sm:$0xff]   ;;  %vm230_vm0 = vcmask 130048   ;;  %s200_s28 = scalar_select %p199_p11, %s760_s15, 1  ;;  %v653_v2 = vld [vmem:[%s1045_s0 + $0x8] sm:$0xff]  }
  0x17   : > { %583 = vmatprep.mubr.msk.bf16.mxu0 %vm230_vm0, %v652_v0  ;;  %p664_p13 = pnand %p663_p12, %p836_p4 }
  0x18   : > { %s575_s29 = sshll.u32 %s200_s28, 3  ;;  %s770_s28 = smov [#allocation2]  }
  0x19   : > { %s206_s5 = scalar_lea.vmem %s1046_s1, %s575_s29  ;;  %p665_p0 = pneg %p664_p13 }
  0x1a   : > { %v651_v1 = vld [vmem:[%s206_s5] sm:$0xff]   ;;  %s666_s29 = sshll.u32 %s770_s28, 4  ;;  %s667_s29 = int_to_ptr.vmem [resolvable:$false] %s666_s29 }
  0x1b   : > { %581 = vmatprep.subr.bf16.mxu0 %v651_v1  ;;  %s668_s30 = scalar_lea.vmem %s667_s29, 512  ;;  %p669_p1 = scmp.lt.s32.totalorder %s921_s18, %s667_s29 }
  0x1c   : > { %582 = vmatpush3.bf16.msra.mxu0 %v651_v1  ;;  %p670_p2 = scmp.lt.s32.totalorder %s668_s30, %s662_s27 }
  0x1e   : > { %p671_p3 = por %p670_p2, %p669_p1 }
  0x1f   : > { %584 = vmatmul.mubr.msk.bf16.vlgmr.msra.gmra.mxu0 %vm230_vm0, %v653_v2 }
  0x20   : > { %p672_p5 = pnand %p671_p3, %p665_p0 }
  0xdf   : > { %v862_v3 = vpop.f32.mrf.mxu0 }
  0xe0   : > { %v288_v5 = vmul.f32 %v862_v3, %v862_v3  ;;  %v869_v6 = vand.u32 2147483647, %v862_v3 }
  0xe1   : > { %v864_v4 = vpop.f32.mrf.mxu0 }
  0xe2   : > { %v286_v7 = vmul.f32 %v864_v4, %v864_v4  ;;  %v874_v8 = vand.u32 2147483647, %v864_v4 }
  0xe3   : > { %v876_v9 = vpop.f32.mrf.mxu0 }
  0xe4   : > { %v290_v10 = vadd.f32 %v288_v5, %v286_v7  ;;  %v311_v11 = vmax.f32 %v874_v8, %v869_v6  ;;  %v289_v12 = vmul.f32 %v876_v9, %v876_v9  ;;  %v885_v14 = vand.u32 2147483647, %v876_v9 }
  0xe5   : > { %v882_v13 = vpop.f32.mrf.mxu0  ;;  %v310_v20 = vmin.f32 %v874_v8, %v869_v6 }
  0xe6   : > { %654 = vrsqrt.f32 %v290_v10  ;;  %v287_v15 = vmul.f32 %v882_v13, %v882_v13  ;;  %v890_v16 = vand.u32 2147483647, %v882_v13  ;;  %vm294_vm1 = vcmp.eq.f32.partialorder %v290_v10, inf }
  0xe7   : > { %656 = vrcp.f32 %v311_v11  ;;  %v297_v24 = vand.u32 2147483648, %v290_v10  ;;  %vm296_vm2 = vcmp.eq.f32.partialorder %v290_v10, 0.0 }
  0xe8   : > { %v291_v17 = vadd.f32 %v289_v12, %v287_v15  ;;  %v358_v18 = vmax.f32 %v890_v16, %v885_v14  ;;  %v357_v28 = vmin.f32 %v890_v16, %v885_v14 }
  0xea   : > { %658 = vrsqrt.f32 %v291_v17  ;;  %vm301_vm3 = vcmp.eq.f32.partialorder %v291_v17, inf  ;;  %v304_v34 = vand.u32 2147483648, %v291_v17  ;;  %vm303_vm4 = vcmp.eq.f32.partialorder %v291_v17, 0.0 }
  0xeb   : > { %660 = vrcp.f32 %v358_v18 }
  0xf3   : > { %v655_v19 = vpop.eup %654 }
  0xf4   : > { %v657_v21 = vpop.eup %656  ;;  %v293_v22 = vmul.f32 %v655_v19, %v290_v10 }
  0xf5   : > { %v900_v23 = vmul.f32 %v657_v21, %v310_v20 }
  0xf6   : > { %v295_v25 = vsel %vm294_vm1, %v290_v10, %v293_v22 }
  0xf7   : > { %v659_v26 = vpop.eup %658  ;;  %v907_v27 = vmul.f32 %v900_v23, %v900_v23  ;;  %v298_v29 = vsel %vm296_vm2, %v297_v24, %v295_v25 }
  0xf8   : > { %v661_v30 = vpop.eup %660  ;;  %v300_v31 = vmul.f32 %v659_v26, %v291_v17  ;;  %306 = vst [vmem:[%s191_s11] sm:$0xff] %v298_v29 }
  0xf9   : > { %v315_v32 = vmul.f32 0.002785687, %v907_v27  ;;  %v912_v33 = vmul.f32 %v661_v30, %v357_v28 }
  0xfa   : > { %v302_v35 = vsel %vm301_vm3, %v291_v17, %v300_v31 }
  0xfb   : > { %v316_v36 = vadd.f32 -0.015866, %v315_v32  ;;  %v361_v37 = vmul.f32 %v912_v33, %v912_v33  ;;  %v305_v38 = vsel %vm303_vm4, %v304_v34, %v302_v35 }
  0xfc   : > { %307 = vst [vmem:[%s191_s11 + $0x8] sm:$0xff] %v305_v38 }
  0xfd   : > { %v317_v39 = vmul.f32 %v316_v36, %v907_v27  ;;  %v362_v40 = vmul.f32 0.002785687, %v361_v37 }
  0xfe   : > { %675 = shalt.err (!%p672_p5)
}
  0xff   : > { %s676_s4 = scalar_lea.hbm %s919_s23, 256  ;;  %s680_s7 = scalar_lea.hbm %s1047_s2, 512 }
 0x100   : > { %p677_p6 = scmp.ne.s32.totalorder %s919_s23, %s676_s4  ;;  %p681_p10 = scmp.lt.s32.totalorder %s919_s23, %s1047_s2 }
 0x101   : > { %p682_p11 = scmp.lt.s32.totalorder %s680_s7, %s676_s4 }
 0x102   : > { %p678_p7 = pnand %p677_p6, %p836_p4 }
 0x103   : > { %p683_p12 = por %p682_p11, %p681_p10 }
 0x104   : > { %p679_p9 = pneg %p678_p7 }
 0x106   : > { %p684_p13 = pnand %p683_p12, %p679_p9 }
 0x108   : > { %687 = shalt.err (!%p684_p13)
}
 0x109   : > { %s771_s21 = smov 128   ;;  %s772_s27 = smov 8   ;;  %v318_v41 = vadd.f32 0.04247222, %v317_v39  ;;  %v363_v42 = vadd.f32 -0.015866, %v362_v40  ;;  %vm332_vm5 = vcmp.gt.f32.partialorder %v869_v6, %v874_v8  ;;  %vm342_vm8 = vcmp.ne.f32.partialorder %v864_v4, %v864_v4 }
 0x10a   : > { %587 = dma.vmem_to_hbm [thread:$0]  (%p836_p4), %s921_s18, 256, %s919_s23, %s405_s26, %s771_s21, %s771_s21, %s772_s27   ;;  %vm338_vm6 = vcmp.lt.s32.totalorder %v864_v4, 0  ;;  %vm340_vm7 = vcmp.eq.f32.partialorder %v862_v3, 0.0  ;;  %vm343_vm9 = vcmp.ne.f32.partialorder %v862_v3, %v862_v3  ;;  %vm335_vm10 = vcmp.lt.f32.partialorder %v864_v4, 0.0 }
 0x10b   : > { %v319_v43 = vmul.f32 %v318_v41, %v907_v27  ;;  %v364_v44 = vmul.f32 %v363_v42, %v361_v37  ;;  %vm348_vm11 = vcmp.eq.s32.totalorder %v874_v8, inf  ;;  %v353_v19 = vand.u32 2147483648, %v862_v3  ;;  %vm344_vm13 = vmor %vm342_vm8, %vm343_vm9  ;;  %s198_s18 = scalar_lea.vmem [#allocation4], %s558_s9  ;;  %s995_s29 = scalar_lea.hbm %s1048_s3, %s576_s10 }
 0x10c   : > { %v773_v21 = vmov 0.0   ;;  %vm379_vm12 = vcmp.gt.f32.partialorder %v885_v14, %v890_v16  ;;  %vm349_vm14 = vcmp.eq.s32.totalorder %v869_v6, inf  ;;  %vm385_vm15 = vcmp.lt.s32.totalorder %v882_v13, 0  ;;  %s441_s23 = sshll.u32 %s198_s18, 4  ;;  %s410_s30 = scalar_lea.sflag [#allocation5], %s895_s8  ;;  %s997_s23 = int_to_ptr.vmem [resolvable:$true] %s441_s23 }
 0x10d   : > { %v320_v45 = vadd.f32 -0.074975304, %v319_v43  ;;  %v365_v46 = vadd.f32 0.04247222, %v364_v44  ;;  %v339_v22 = vsel %vm338_vm6, 3.1415927, %v773_v21  ;;  %vm350_vm0 = vmand %vm348_vm11, %vm349_vm14  ;;  %vm389_vm1 = vcmp.ne.f32.partialorder %v882_v13, %v882_v13 }
 0x10e   : > { %v774_v4 = vmov 0.7853982   ;;  %vm387_vm2 = vcmp.eq.f32.partialorder %v876_v9, 0.0  ;;  %vm382_vm3 = vcmp.lt.f32.partialorder %v882_v13, 0.0  ;;  %vm395_vm4 = vcmp.eq.s32.totalorder %v890_v16, inf  ;;  %s688_s9 = scalar_lea.vmem %s997_s23, 256 }
 0x10f   : > { %v321_v47 = vmul.f32 %v320_v45, %v907_v27  ;;  %v366_v48 = vmul.f32 %v365_v46, %v361_v37  ;;  %v347_v26 = vsel %vm335_vm10, 2.3561945, %v774_v4  ;;  %v386_v29 = vsel %vm385_vm15, 3.1415927, %v773_v21  ;;  %p689_p0 = scmp.ne.s32.totalorder %s997_s23, %s688_s9  ;;  %s775_s4 = smov [#allocation4]  }
 0x110   : > { %v394_v32 = vsel %vm382_vm3, 2.3561945, %v774_v4  ;;  %v400_v16 = vand.u32 2147483648, %v876_v9  ;;  %s692_s5 = sshll.u32 %s775_s4, 4  ;;  %s693_s5 = int_to_ptr.vmem [resolvable:$false] %s692_s5 }
 0x111   : > { %v322_v49 = vadd.f32 0.1064488, %v321_v47  ;;  %v367_v50 = vadd.f32 -0.074975304, %v366_v48  ;;  %p690_p1 = pnand %p689_p0, %p836_p4  ;;  %s694_s15 = scalar_lea.vmem %s693_s5, 512 }
 0x112   : > { %p695_p3 = scmp.lt.s32.totalorder %s997_s23, %s693_s5  ;;  %p696_p5 = scmp.lt.s32.totalorder %s694_s15, %s688_s9 }
 0x113   : > { %v323_v51 = vmul.f32 %v322_v49, %v907_v27  ;;  %v368_v52 = vmul.f32 %v367_v50, %v361_v37  ;;  %p691_p2 = pneg %p690_p1 }
 0x114   : > { %p697_p6 = por %p696_p5, %p695_p3 }
 0x115   : > { %v324_v53 = vadd.f32 -0.14207031, %v323_v51  ;;  %v369_v54 = vadd.f32 0.1064488, %v368_v52 }
 0x116   : > { %p698_p7 = pnand %p697_p6, %p691_p2 }
 0x117   : > { %v325_v55 = vmul.f32 %v324_v53, %v907_v27  ;;  %v370_v56 = vmul.f32 %v369_v54, %v361_v37 }
 0x119   : > { %v326_v57 = vadd.f32 0.19993454, %v325_v55  ;;  %v371_v58 = vadd.f32 -0.14207031, %v370_v56 }
 0x11b   : > { %v327_v59 = vmul.f32 %v326_v57, %v907_v27  ;;  %v372_v60 = vmul.f32 %v371_v58, %v361_v37 }
 0x11d   : > { %v328_v61 = vadd.f32 -0.33333147, %v327_v59  ;;  %v373_v62 = vadd.f32 0.19993454, %v372_v60 }
 0x11f   : > { %v329_v63 = vmul.f32 %v328_v61, %v907_v27  ;;  %v374_v0 = vmul.f32 %v373_v62, %v361_v37 }
 0x121   : > { %v330_v1 = vmul.f32 %v329_v63, %v900_v23  ;;  %v375_v2 = vadd.f32 -0.33333147, %v374_v0 }
 0x123   : > { %v331_v5 = vadd.f32 %v330_v1, %v900_v23  ;;  %v376_v7 = vmul.f32 %v375_v2, %v361_v37 }
 0x125   : > { %v333_v10 = vsub.f32 1.5707964, %v331_v5  ;;  %v377_v11 = vmul.f32 %v376_v7, %v912_v33 }
 0x127   : > { %v334_v12 = vsel %vm332_vm5, %v333_v10, %v331_v5  ;;  %v378_v15 = vadd.f32 %v377_v11, %v912_v33  ;;  %vm390_vm5 = vcmp.ne.f32.partialorder %v876_v9, %v876_v9 }
 0x128   : > { %v336_v17 = vsub.f32 3.1415927, %v334_v12  ;;  %vm391_vm6 = vmor %vm389_vm1, %vm390_vm5 }
 0x129   : > { %v380_v18 = vsub.f32 1.5707964, %v378_v15 }
 0x12a   : > { %v337_v20 = vsel %vm335_vm10, %v336_v17, %v334_v12 }
 0x12b   : > { %v341_v23 = vsel %vm340_vm7, %v339_v22, %v337_v20  ;;  %v381_v24 = vsel %vm379_vm12, %v380_v18, %v378_v15  ;;  %vm396_vm7 = vcmp.eq.s32.totalorder %v885_v14, inf }
 0x12c   : > { %v345_v25 = vsel %vm344_vm13, nan, %v341_v23  ;;  %v383_v3 = vsub.f32 3.1415927, %v381_v24  ;;  %vm397_vm8 = vmand %vm395_vm4, %vm396_vm7 }
 0x12d   : > { %v351_v27 = vsel %vm350_vm0, %v347_v26, %v345_v25 }
 0x12e   : > { %v352_v6 = vand.u32 2147483647, %v351_v27  ;;  %v384_v28 = vsel %vm382_vm3, %v383_v3, %v381_v24 }
 0x12f   : > { %v388_v8 = vsel %vm387_vm2, %v386_v29, %v384_v28 }
 0x130   : > { %v354_v30 = vor.u32 %v353_v19, %v352_v6  ;;  %v392_v31 = vsel %vm391_vm6, nan, %v388_v8 }
 0x131   : > { %v398_v13 = vsel %vm397_vm8, %v394_v32, %v392_v31 }
 0x132   : > { %v399_v33 = vand.u32 2147483647, %v398_v13  ;;  %402 = vst [vmem:[%s198_s18] sm:$0xff] %v354_v30 }
 0x134   : > { %v401_v34 = vor.u32 %v400_v16, %v399_v33 }
 0x136   : > { %403 = vst [vmem:[%s198_s18 + $0x8] sm:$0xff] %v401_v34 }
 0x137   : > { %701 = shalt.err (!%p698_p7)
}
 0x138   : > { %s702_s10 = scalar_lea.hbm %s995_s29, 256  ;;  %s706_s7 = scalar_lea.hbm %s1048_s3, 512 }
 0x139   : > { %p703_p9 = scmp.ne.s32.totalorder %s995_s29, %s702_s10  ;;  %p707_p12 = scmp.lt.s32.totalorder %s995_s29, %s1048_s3 }
 0x13a   : > { %p708_p13 = scmp.lt.s32.totalorder %s706_s7, %s702_s10 }
 0x13b   : > { %p704_p10 = pnand %p703_p9, %p836_p4 }
 0x13c   : > { %p709_p0 = por %p708_p13, %p707_p12 }
 0x13d   : > { %p705_p11 = pneg %p704_p10 }
 0x13f   : > { %p710_p1 = pnand %p709_p0, %p705_p11 }
 0x141   : > { %713 = shalt.err (!%p710_p1)
}
 0x142   : > { %588 = dma.vmem_to_hbm [thread:$0]  (%p836_p4), %s997_s23, 256, %s995_s29, %s410_s30, %s771_s21, %s771_s21, %s772_s27  }
 0x143 PF: > { %p598_p2 = scmp.ge.s32.totalorder %s768_s17, 2  ;;  %s456_s18 = sand.u32 1, %s748_s12  }
 0x144   : > { %s457_s26 = scalar_lea.sflag [#allocation3], %s456_s18 }
 0x145   : > { %p592_p3 = pnand %p598_p2, %p843_p8 }
 0x147   : > { %p593_p5 = pneg %p592_p3 }
 0x149   : > { %739 = dma.done.wait (%p593_p5), %s457_s26, 256  }
 0x14a   : > { %741 = vsyncadd (%p593_p5), %s457_s26, 4294967040  ;;  %s466_s28 = scalar_lea.sflag [#allocation5], %s456_s18 }
 0x14b   : > { %743 = dma.done.wait (%p593_p5), %s466_s28, 256  }
 0x14c   : > { %745 = vsyncadd (%p593_p5), %s466_s28, 4294967040  ;;  %s20_s17 = sadd.s32 1, %s768_s17   ;;  %s1051_s12 = smov %s752_s13 }
 0x14d   : > { %p17_p6 = scmp.ge.s32.totalorder %s20_s17, 4   ;;  %s1052_s13 = smov %s756_s14 }
 0x14e   : > { %s1053_s14 = smov %s849_s25  ;;  %s1054_s15 = smov %s764_s16 }
 0x14f   : > { %s1055_s16 = smov %s1057_s20  ;;  %19 = sbr.rel (!%p17_p6) target bundleno = 6 (0x6), region = 80 }
 0x154   :  { %471 = vsyncpa [#allocation3], 1 }
 0x155   :  { %473 = vsyncpa [#allocation3 + $0x1], 1 }
 0x156   :  { %474 = vsyncpa [#allocation5], 1 }
 0x157   :  { %476 = vsyncpa [#allocation5 + $0x1], 1 }

</bundles_post_ra>
